<compile_context>
chip_gen: v5e
topology: v5e:2x2
jax: 0.10.0
libtpu: 0.0.40
codegen_flags: <defaults>
</compile_context>

<pallas_src>
import jax
import jax.numpy as jnp
from jax.experimental import pallas as pl
from jax.experimental.pallas import tpu as pltpu


def _round_up(n, m):
    return ((n + m - 1) // m) * m


# ----------------------------------------------------------------------------
# Kernels
# ----------------------------------------------------------------------------
def _forward_block(x, wb, bb, w1, b1, w2, b2):
    """x: [TB, C, HW] (bf16). Weights lane-padded; 1/HW already folded into wb."""
    # backbone: global average pool (scale folded into wb) + Linear + ReLU
    pooled = jnp.sum(x.astype(jnp.float32), axis=-1)                    # [TB, C]
    pre = jnp.dot(pooled.astype(wb.dtype), wb,
                  preferred_element_type=jnp.float32) + bb              # [TB, Dp]
    pre = jnp.maximum(pre, 0.0)

    # contrastive head (mlp): Linear -> ReLU -> Linear
    h = jnp.dot(pre.astype(w1.dtype), w1,
                preferred_element_type=jnp.float32) + b1                # [TB, Dp]
    h = jnp.maximum(h, 0.0)
    feats = jnp.dot(h.astype(w2.dtype), w2,
                    preferred_element_type=jnp.float32) + b2            # [TB, F]

    # F.normalize(dim=1): x / max(||x||, eps), eps=1e-12.
    # Clamp sq at eps^2 and use EUP rsqrt (equivalent to clamping the norm).
    sq = jnp.sum(feats * feats, axis=-1, keepdims=True)
    inv = jax.lax.rsqrt(jnp.maximum(sq, 1e-24))
    return feats * inv, pre


def _kernel_with_pre(x_ref, wb_ref, bb_ref, w1_ref, b1_ref, w2_ref, b2_ref,
                     feat_ref, pre_ref):
    feats, pre = _forward_block(x_ref[...], wb_ref[...], bb_ref[...],
                                w1_ref[...], b1_ref[...],
                                w2_ref[...], b2_ref[...])
    feat_ref[...] = feats.astype(feat_ref.dtype)
    pre_ref[...] = pre.astype(pre_ref.dtype)


def _kernel_feats_only(x_ref, wb_ref, bb_ref, w1_ref, b1_ref, w2_ref, b2_ref,
                       feat_ref):
    feats, _ = _forward_block(x_ref[...], wb_ref[...], bb_ref[...],
                              w1_ref[...], b1_ref[...],
                              w2_ref[...], b2_ref[...])
    feat_ref[...] = feats.astype(feat_ref.dtype)


# ----------------------------------------------------------------------------
# Parameter construction / preparation (done once, not per forward call)
# ----------------------------------------------------------------------------
def make_params(key, in_channels, backbone_dim, features_dim):
    """Deterministic synthetic parameters (weights stored [in, out], f32)."""
    ks = jax.random.split(key, 6)
    scale = 0.1
    wb = scale * jax.random.normal(ks[0], (in_channels, backbone_dim), jnp.float32)
    bb = scale * jax.random.normal(ks[1], (1, backbone_dim), jnp.float32)
    w1 = scale * jax.random.normal(ks[2], (backbone_dim, backbone_dim), jnp.float32)
    b1 = scale * jax.random.normal(ks[3], (1, backbone_dim), jnp.float32)
    w2 = scale * jax.random.normal(ks[4], (backbone_dim, features_dim), jnp.float32)
    b2 = scale * jax.random.normal(ks[5], (1, features_dim), jnp.float32)
    return wb, bb, w1, b1, w2, b2


def prepare_params(params, hw):
    """Fold 1/HW into wb, zero-pad backbone_dim to a lane-dense multiple of 128,
    and cast matmul weights to bf16.  Zero padding keeps the math exact on the
    real D columns (padded pre/h columns are ReLU(0)=0 and w2's padded rows
    multiply those zeros)."""
    wb, bb, w1, b1, w2, b2 = params
    C, D = wb.shape
    F = w2.shape[1]
    Dp = _round_up(D, 128)
    f32 = jnp.float32

    wb_p = jnp.zeros((C, Dp), f32).at[:, :D].set(wb / float(hw))
    bb_p = jnp.zeros((1, Dp), f32).at[:, :D].set(bb)
    w1_p = jnp.zeros((Dp, Dp), f32).at[:D, :D].set(w1)
    b1_p = jnp.zeros((1, Dp), f32).at[:, :D].set(b1)
    w2_p = jnp.zeros((Dp, F), f32).at[:D, :].set(w2)

    return dict(
        wb=wb_p.astype(jnp.bfloat16), bb=bb_p,
        w1=w1_p.astype(jnp.bfloat16), b1=b1_p,
        w2=w2_p.astype(jnp.bfloat16), b2=b2.astype(f32),
        backbone_dim=D, padded_dim=Dp, features_dim=F, hw=hw,
    )


# ----------------------------------------------------------------------------
# Forward wrapper
# ----------------------------------------------------------------------------
def contrastive_forward(x_nchw, prep, return_pre_last=False, tile_b=None):
    """x_nchw: [B, C, H, W] float32.  prep: output of prepare_params."""
    B, C, H, W = x_nchw.shape
    HW = H * W
    assert HW == prep["hw"], "params were prepared for a different spatial size"

    # bf16 halves the dominant HBM traffic; accumulation stays f32 in-kernel.
    x = x_nchw.reshape(B, C, HW).astype(jnp.bfloat16)

    D = prep["backbone_dim"]
    Dp = prep["padded_dim"]
    F = prep["features_dim"]
    wb, bb, w1, b1, w2, b2 = (prep[k] for k in ("wb", "bb", "w1", "b1", "w2", "b2"))

    # Batch tile: small batches use the whole batch (full-dim block is legal);
    # large batches stream 512-row tiles (multiple of 8, a few MiB of bf16).
    if tile_b is None:
        tile_b = B if B <= 512 else 512
    grid = (pl.cdiv(B, tile_b),)

    def resident(a):
        return pl.BlockSpec(a.shape, lambda i, _nd=a.ndim: (0,) * _nd)

    in_specs = [
        pl.BlockSpec((tile_b, C, HW), lambda i: (i, 0, 0)),   # streamed x tiles
        resident(wb), resident(bb),
        resident(w1), resident(b1),
        resident(w2), resident(b2),
    ]
    feat_spec = pl.BlockSpec((tile_b, F), lambda i: (i, 0))
    cparams = pltpu.CompilerParams(dimension_semantics=("parallel",))

    if return_pre_last:
        feats, pre_pad = pl.pallas_call(
            _kernel_with_pre,
            grid=grid,
            in_specs=in_specs,
            out_specs=(feat_spec, pl.BlockSpec((tile_b, Dp), lambda i: (i, 0))),
            out_shape=(jax.ShapeDtypeStruct((B, F), jnp.float32),
                       jax.ShapeDtypeStruct((B, Dp), jnp.float32)),
            compiler_params=cparams,
        )(x, wb, bb, w1, b1, w2, b2)
        return feats, pre_pad[:, :D]

    feats = pl.pallas_call(
        _kernel_feats_only,
        grid=grid,
        in_specs=in_specs,
        out_specs=feat_spec,
        out_shape=jax.ShapeDtypeStruct((B, F), jnp.float32),
        compiler_params=cparams,
    )(x, wb, bb, w1, b1, w2, b2)
    return feats


if __name__ == "__main__":
    B, C, H, W = 8, 8, 16, 16
    backbone_dim, features_dim = 32, 128

    key = jax.random.PRNGKey(0)
    kx, kp = jax.random.split(key)
    x = jax.random.normal(kx, (B, C, H, W), jnp.float32)

    params = make_params(kp, C, backbone_dim, features_dim)
    prep = prepare_params(params, H * W)

    # return_pre_last=True path
    feats, pre_last = contrastive_forward(x, prep, return_pre_last=True)
    jax.block_until_ready((feats, pre_last))

    # inference path (no pre_last writeback)
    feats_only = contrastive_forward(x, prep, return_pre_last=False)
    jax.block_until_ready(feats_only)

    # sanity: shapes, finiteness, and unit-norm features along dim=1
    assert feats.shape == (B, features_dim)
    assert pre_last.shape == (B, backbone_dim)
    assert feats_only.shape == (B, features_dim)
    norms = jnp.sqrt(jnp.sum(feats * feats, axis=1))
    assert bool(jnp.all(jnp.isfinite(feats)))
    assert bool(jnp.all(jnp.abs(norms - 1.0) < 1e-4))
    assert bool(jnp.max(jnp.abs(feats - feats_only)) < 1e-6)

    print("KERNEL_OK")
</pallas_src>

<mosaic_0001>
module attributes {stable_mosaic.version = 11 : i64} {
  func.func @_kernel_with_pre(%arg0: i32, %arg1: memref<8x8x256xbf16, #tpu.memory_space<vmem>>, %arg2: memref<8x128xbf16, #tpu.memory_space<vmem>>, %arg3: memref<1x128xf32, #tpu.memory_space<vmem>>, %arg4: memref<128x128xbf16, #tpu.memory_space<vmem>>, %arg5: memref<1x128xf32, #tpu.memory_space<vmem>>, %arg6: memref<128x128xbf16, #tpu.memory_space<vmem>>, %arg7: memref<1x128xf32, #tpu.memory_space<vmem>>, %arg8: memref<8x128xf32, #tpu.memory_space<vmem>>, %arg9: memref<8x128xf32, #tpu.memory_space<vmem>>) attributes {dimension_semantics = [#tpu.dimension_semantics<parallel>], iteration_bounds = array<i64: 1>, scalar_prefetch = 0 : i64, scratch_operands = 0 : i64, tpu.core_type = #tpu.core_type<tc>, window_params = [{transform_indices = @transform_0, window_bounds = array<i64: 8, 8, 256>}, {pipeline_mode = #tpu.pipeline_mode<synchronous>, transform_indices = @transform_1, window_bounds = array<i64: 8, 128>}, {pipeline_mode = #tpu.pipeline_mode<synchronous>, transform_indices = @transform_2, window_bounds = array<i64: 1, 128>}, {pipeline_mode = #tpu.pipeline_mode<synchronous>, transform_indices = @transform_3, window_bounds = array<i64: 128, 128>}, {pipeline_mode = #tpu.pipeline_mode<synchronous>, transform_indices = @transform_4, window_bounds = array<i64: 1, 128>}, {pipeline_mode = #tpu.pipeline_mode<synchronous>, transform_indices = @transform_5, window_bounds = array<i64: 128, 128>}, {pipeline_mode = #tpu.pipeline_mode<synchronous>, transform_indices = @transform_6, window_bounds = array<i64: 1, 128>}, {transform_indices = @transform_7, window_bounds = array<i64: 8, 128>}, {transform_indices = @transform_8, window_bounds = array<i64: 8, 128>}]} {
    %c0 = arith.constant 0 : index
    %c0_0 = arith.constant 0 : index
    %c0_1 = arith.constant 0 : index
    %0 = vector.load %arg1[%c0, %c0_0, %c0_1] : memref<8x8x256xbf16, #tpu.memory_space<vmem>>, vector<8x8x256xbf16>
    %c0_2 = arith.constant 0 : index
    %c0_3 = arith.constant 0 : index
    %1 = vector.load %arg2[%c0_2, %c0_3] : memref<8x128xbf16, #tpu.memory_space<vmem>>, vector<8x128xbf16>
    %c0_4 = arith.constant 0 : index
    %c0_5 = arith.constant 0 : index
    %2 = vector.load %arg3[%c0_4, %c0_5] : memref<1x128xf32, #tpu.memory_space<vmem>>, vector<1x128xf32>
    %c0_6 = arith.constant 0 : index
    %c0_7 = arith.constant 0 : index
    %3 = vector.load %arg4[%c0_6, %c0_7] : memref<128x128xbf16, #tpu.memory_space<vmem>>, vector<128x128xbf16>
    %c0_8 = arith.constant 0 : index
    %c0_9 = arith.constant 0 : index
    %4 = vector.load %arg5[%c0_8, %c0_9] : memref<1x128xf32, #tpu.memory_space<vmem>>, vector<1x128xf32>
    %c0_10 = arith.constant 0 : index
    %c0_11 = arith.constant 0 : index
    %5 = vector.load %arg6[%c0_10, %c0_11] : memref<128x128xbf16, #tpu.memory_space<vmem>>, vector<128x128xbf16>
    %c0_12 = arith.constant 0 : index
    %c0_13 = arith.constant 0 : index
    %6 = vector.load %arg7[%c0_12, %c0_13] : memref<1x128xf32, #tpu.memory_space<vmem>>, vector<1x128xf32>
    %7 = arith.extf %0 : vector<8x8x256xbf16> to vector<8x8x256xf32>
    %cst = arith.constant dense<0.000000e+00> : vector<8x8xf32>
    %8 = vector.multi_reduction <add>, %7, %cst [2] : vector<8x8x256xf32> to vector<8x8xf32>
    %9 = arith.truncf %8 : vector<8x8xf32> to vector<8x8xbf16>
    %cst_14 = arith.constant dense<0.000000e+00> : vector<8x128xf32>
    %10 = tpu.matmul %9, %1, %cst_14 {dimension_numbers = #tpu.dot_dimension_numbers<[1], [0], [0], [1], [0, 0, 1, 1], [], []>} : vector<8x8xbf16>, vector<8x128xbf16>, vector<8x128xf32> -> vector<8x128xf32>
    %11 = vector.broadcast %2 : vector<1x128xf32> to vector<8x128xf32>
    %12 = arith.addf %10, %11 : vector<8x128xf32>
    %cst_15 = arith.constant 0.000000e+00 : f32
    %13 = vector.broadcast %cst_15 : f32 to vector<8x128xf32>
    %14 = arith.maximumf %12, %13 : vector<8x128xf32>
    %15 = arith.truncf %14 : vector<8x128xf32> to vector<8x128xbf16>
    %cst_16 = arith.constant dense<0.000000e+00> : vector<8x128xf32>
    %16 = tpu.matmul %15, %3, %cst_16 {dimension_numbers = #tpu.dot_dimension_numbers<[1], [0], [0], [1], [0, 0, 1, 1], [], []>} : vector<8x128xbf16>, vector<128x128xbf16>, vector<8x128xf32> -> vector<8x128xf32>
    %17 = vector.broadcast %4 : vector<1x128xf32> to vector<8x128xf32>
    %18 = arith.addf %16, %17 : vector<8x128xf32>
    %cst_17 = arith.constant 0.000000e+00 : f32
    %19 = vector.broadcast %cst_17 : f32 to vector<8x128xf32>
    %20 = arith.maximumf %18, %19 : vector<8x128xf32>
    %21 = arith.truncf %20 : vector<8x128xf32> to vector<8x128xbf16>
    %cst_18 = arith.constant dense<0.000000e+00> : vector<8x128xf32>
    %22 = tpu.matmul %21, %5, %cst_18 {dimension_numbers = #tpu.dot_dimension_numbers<[1], [0], [0], [1], [0, 0, 1, 1], [], []>} : vector<8x128xbf16>, vector<128x128xbf16>, vector<8x128xf32> -> vector<8x128xf32>
    %23 = vector.broadcast %6 : vector<1x128xf32> to vector<8x128xf32>
    %24 = arith.addf %22, %23 : vector<8x128xf32>
    %25 = arith.mulf %24, %24 : vector<8x128xf32>
    %cst_19 = arith.constant dense<0.000000e+00> : vector<8xf32>
    %26 = vector.multi_reduction <add>, %25, %cst_19 [1] : vector<8x128xf32> to vector<8xf32>
    %27 = vector.shape_cast %26 : vector<8xf32> to vector<8x1xf32>
    %cst_20 = arith.constant 1.000000e-24 : f32
    %28 = vector.broadcast %cst_20 : f32 to vector<8x1xf32>
    %29 = arith.maximumf %27, %28 : vector<8x1xf32>
    %30 = math.rsqrt %29 : vector<8x1xf32>
    %31 = vector.broadcast %30 : vector<8x1xf32> to vector<8x128xf32>
    %32 = arith.mulf %24, %31 : vector<8x128xf32>
    %c0_21 = arith.constant 0 : index
    %c0_22 = arith.constant 0 : index
    %33 = vector.load %arg8[%c0_21, %c0_22] : memref<8x128xf32, #tpu.memory_space<vmem>>, vector<8x128xf32>
    tpu.vector_store %arg8[%c0_21, %c0_22], %32 {strides = array<i32>} : memref<8x128xf32, #tpu.memory_space<vmem>>, vector<8x128xf32>,
    %c0_23 = arith.constant 0 : index
    %c0_24 = arith.constant 0 : index
    %34 = vector.load %arg9[%c0_23, %c0_24] : memref<8x128xf32, #tpu.memory_space<vmem>>, vector<8x128xf32>
    tpu.vector_store %arg9[%c0_23, %c0_24], %14 {strides = array<i32>} : memref<8x128xf32, #tpu.memory_space<vmem>>, vector<8x128xf32>,
    return
  }
  func.func @transform_0(%arg0: i32) -> (i32, i32, i32) {
    %c0_i32 = arith.constant 0 : i32
    %c0_i32_0 = arith.constant 0 : i32
    %c0_i32_1 = arith.constant 0 : i32
    return %arg0, %c0_i32, %c0_i32_0 : i32, i32, i32
  }
  func.func @transform_1(%arg0: i32) -> (i32, i32) {
    %c0_i32 = arith.constant 0 : i32
    %c0_i32_0 = arith.constant 0 : i32
    %c0_i32_1 = arith.constant 0 : i32
    return %c0_i32, %c0_i32_0 : i32, i32
  }
  func.func @transform_2(%arg0: i32) -> (i32, i32) {
    %c0_i32 = arith.constant 0 : i32
    %c0_i32_0 = arith.constant 0 : i32
    %c0_i32_1 = arith.constant 0 : i32
    return %c0_i32, %c0_i32_0 : i32, i32
  }
  func.func @transform_3(%arg0: i32) -> (i32, i32) {
    %c0_i32 = arith.constant 0 : i32
    %c0_i32_0 = arith.constant 0 : i32
    %c0_i32_1 = arith.constant 0 : i32
    return %c0_i32, %c0_i32_0 : i32, i32
  }
  func.func @transform_4(%arg0: i32) -> (i32, i32) {
    %c0_i32 = arith.constant 0 : i32
    %c0_i32_0 = arith.constant 0 : i32
    %c0_i32_1 = arith.constant 0 : i32
    return %c0_i32, %c0_i32_0 : i32, i32
  }
  func.func @transform_5(%arg0: i32) -> (i32, i32) {
    %c0_i32 = arith.constant 0 : i32
    %c0_i32_0 = arith.constant 0 : i32
    %c0_i32_1 = arith.constant 0 : i32
    return %c0_i32, %c0_i32_0 : i32, i32
  }
  func.func @transform_6(%arg0: i32) -> (i32, i32) {
    %c0_i32 = arith.constant 0 : i32
    %c0_i32_0 = arith.constant 0 : i32
    %c0_i32_1 = arith.constant 0 : i32
    return %c0_i32, %c0_i32_0 : i32, i32
  }
  func.func @transform_7(%arg0: i32) -> (i32, i32) {
    %c0_i32 = arith.constant 0 : i32
    %c0_i32_0 = arith.constant 0 : i32
    return %arg0, %c0_i32 : i32, i32
  }
  func.func @transform_8(%arg0: i32) -> (i32, i32) {
    %c0_i32 = arith.constant 0 : i32
    %c0_i32_0 = arith.constant 0 : i32
    return %arg0, %c0_i32 : i32, i32
  }
}

</mosaic_0001>

<bundles_post_ra>
// kernel: tpu_custom_call.1
= control target key start
LH: loop header
LB: loop body
LE: loop exit
PB: predicated region body
PF: predicated region fallthrough
CT: control target
= control target key end

     0   :  { %14 = vsyncpa [#allocation3], 0  ;;  %s765_s0 = inlined_call_operand.hbm [shape: bf16[8,8,256], index: 0, kind: input, shape index: {}]   ;;  %s766_s1 = inlined_call_operand.hbm [shape: bf16[8,128], index: 1, kind: input, shape index: {}]   ;;  %s767_s2 = inlined_call_operand.vmem [shape: f32[1,128], index: 2, kind: input, shape index: {}]   ;;  %s768_s3 = inlined_call_operand.hbm [shape: bf16[128,128], index: 3, kind: input, shape index: {}]   ;;  %s769_s4 = inlined_call_operand.vmem [shape: f32[1,128], index: 4, kind: input, shape index: {}]   ;;  %s770_s5 = inlined_call_operand.hbm [shape: bf16[128,128], index: 5, kind: input, shape index: {}]   ;;  %s771_s6 = inlined_call_operand.vmem [shape: f32[1,128], index: 6, kind: input, shape index: {}]   ;;  %s772_s7 = inlined_call_operand.hbm [shape: f32[8,128], index: 7, kind: output, shape index: {0}]   ;;  %s773_s8 = inlined_call_operand.hbm [shape: f32[8,128], index: 8, kind: output, shape index: {1}]  }
   0x1   :  { %15 = vsyncpa [#allocation6], 0 }
   0x2   :  { %16 = vsyncpa [#allocation9], 0 }
   0x3   :  { %17 = vsyncpa [#allocation4], 0  ;;  %s37_s29 = sshll.u32 %s766_s1, 4  ;;  %s38_s29 = int_to_ptr.hbm [resolvable:$true] %s37_s29 }
   0x4   :  { %18 = vsyncpa [#allocation12], 0  ;;  %s683_s30 = smov [#allocation5]   ;;  %s23_s12 = sshll.u32 %s765_s0, 4  ;;  %s24_s12 = int_to_ptr.hbm [resolvable:$true] %s23_s12 }
   0x5   :  { %s39_s9 = sshll.u32 %s683_s30, 4  ;;  %s684_s13 = smov [#allocation2]   ;;  %s40_s9 = int_to_ptr.vmem [resolvable:$true] %s39_s9 }
   0x6   :  { %42 = dma.hbm_to_vmem [thread:$0]  %s38_s29, 64, %s40_s9, [#allocation6]  }
   0x7   :  { %s25_s14 = sshll.u32 %s684_s13, 4  ;;  %s685_s15 = smov 128   ;;  %s26_s14 = int_to_ptr.vmem [resolvable:$true] %s25_s14 }
   0x8   :  { %s686_s16 = smov 8   ;;  %s49_s1 = sshll.u32 %s768_s3, 4  ;;  %s50_s1 = int_to_ptr.hbm [resolvable:$true] %s49_s1 }
   0x9   :  { %31 = dma.hbm_to_vmem [thread:$0]  %s24_s12, 1024, %s26_s14, [#allocation3], %s685_s15, %s685_s15, %s686_s16  }
   0xa   :  { %s687_s19 = smov [#allocation7]   ;;  %s64_s0 = sshll.u32 %s770_s5, 4  ;;  %s65_s0 = int_to_ptr.hbm [resolvable:$true] %s64_s0 }
   0xb   :  { %s51_s20 = sshll.u32 %s687_s19, 4  ;;  %s688_s23 = smov 64   ;;  %s52_s20 = int_to_ptr.vmem [resolvable:$true] %s51_s20 }
   0xc   :  { %s689_s24 = smov 4   ;;  %s690_s25 = smov [#allocation8]  }
   0xd   :  { %57 = dma.hbm_to_vmem [thread:$0]  %s50_s1, 1024, %s52_s20, [#allocation6], %s688_s23, %s688_s23, %s689_s24  }
   0xe   :  { %s66_s26 = sshll.u32 %s690_s25, 4  ;;  %s67_s26 = int_to_ptr.vmem [resolvable:$true] %s66_s26 }
   0xf   :  { %72 = dma.hbm_to_vmem [thread:$0]  %s65_s0, 1024, %s67_s26, [#allocation9], %s688_s23, %s688_s23, %s689_s24  }
  0x10   :  { %673 = dma.done.wait [#allocation3], 1024  }
  0x11   :  { %674 = vsyncadd [#allocation3], 4294966272 }
  0x12   :  { %675 = dma.done.wait [#allocation6], 1088  }
  0x13   :  { %676 = vsyncadd [#allocation6], 4294966208 }
  0x14   :  { %677 = dma.done.wait [#allocation9], 1024  }
  0x15   :  { %678 = vsyncadd [#allocation9], 4294966272  ;;  %v92_v0 = vld [vmem:[#allocation2] sm:$0xff]  ;;  %v94_v1 = vld [vmem:[#allocation2 + $0x10] sm:$0xff]  ;;  %vm232_vm0 = vcmask 1043456   ;;  %v203_v40 = vlaneseq  ;;  %vm213_vm1 = vcmask 1041409  }
  0x16   :  { %v96_v2 = vld [vmem:[#allocation2 + $0x20] sm:$0xff]  ;;  %v136_v3 = vunpack.c.l.bf16 %v92_v0  ;;  %v137_v4 = vunpack.c.h.bf16 %v92_v0  ;;  %v140_v5 = vunpack.c.l.bf16 %v94_v1  ;;  %v141_v6 = vunpack.c.h.bf16 %v94_v1  ;;  %v93_v9 = vld [vmem:[#allocation2 + $0x8] sm:$0xff]  ;;  %v95_v10 = vld [vmem:[#allocation2 + $0x18] sm:$0xff]  ;;  %s691_s30 = smov [#allocation11]  }
  0x17   :  { %v144_v7 = vunpack.c.l.bf16 %v96_v2  ;;  %v145_v8 = vunpack.c.h.bf16 %v96_v2  ;;  %v97_v13 = vld [vmem:[#allocation2 + $0x28] sm:$0xff]  ;;  %v138_v15 = vunpack.c.l.bf16 %v93_v9  ;;  %v139_v16 = vunpack.c.h.bf16 %v93_v9  ;;  %v98_v24 = vld [vmem:[#allocation2 + $0x30] sm:$0xff]  ;;  %v99_v25 = vld [vmem:[#allocation2 + $0x38] sm:$0xff]  ;;  %s414_s9 = sshll.u32 %s691_s30, 4  ;;  %s415_s9 = int_to_ptr.vmem [resolvable:$true] %s414_s9 }
  0x18   :  { %v152_v11 = vadd.f32 %v137_v4, %v136_v3  ;;  %v158_v12 = vadd.f32 %v141_v6, %v140_v5  ;;  %v142_v17 = vunpack.c.l.bf16 %v95_v10  ;;  %v143_v18 = vunpack.c.h.bf16 %v95_v10  ;;  %v100_v32 = vld [vmem:[#allocation5] sm:$0xf]  ;;  %v504_v35 = vld [vmem:[#allocation7 + $0x30] sm:$0xff]  ;;  %v503_v39 = vld [vmem:[#allocation7 + $0x28] sm:$0xff] }
  0x19   :  { %v164_v14 = vadd.f32 %v145_v8, %v144_v7  ;;  %v146_v19 = vunpack.c.l.bf16 %v97_v13  ;;  %v147_v20 = vunpack.c.h.bf16 %v97_v13  ;;  %v155_v21 = vadd.f32 %v139_v16, %v138_v15  ;;  %v505_v34 = vld [vmem:[#allocation7 + $0x38] sm:$0xff]  ;;  %v502_v42 = vld [vmem:[#allocation7 + $0x20] sm:$0xff]  ;;  %v500_v61 = vld [vmem:[#allocation7 + $0x10] sm:$0xff] }
  0x1a   :  { %153 = vadd.xlane.f32.xlu0 %v152_v11  ;;  %159 = vadd.xlane.f32.xlu1 %v158_v12  ;;  %v161_v22 = vadd.f32 %v143_v18, %v142_v17  ;;  %v148_v26 = vunpack.c.l.bf16 %v98_v24  ;;  %v149_v27 = vunpack.c.h.bf16 %v98_v24  ;;  %v150_v28 = vunpack.c.l.bf16 %v99_v25  ;;  %v501_v52 = vld [vmem:[#allocation7 + $0x18] sm:$0xff]  ;;  %v499_v18 = vld [vmem:[#allocation7 + $0x8] sm:$0xff] }
  0x1b   :  { %165 = vadd.xlane.f32.xlu2 %v164_v14  ;;  %v167_v23 = vadd.f32 %v147_v20, %v146_v19  ;;  %v151_v29 = vunpack.c.h.bf16 %v99_v25  ;;  %v234_v33 = vsel %vm232_vm0, %v100_v32, 0  ;;  %302 = vmatpush.bf16.msra.mxu1 %v505_v34  ;;  %v204_v44 = vand.u32 127, %v203_v40  ;;  %v498_v19 = vld [vmem:[#allocation7] sm:$0xff]  ;;  %v513_v20 = vld [vmem:[#allocation8 + $0x38] sm:$0xff]  ;;  %v508_v25 = vld [vmem:[#allocation8 + $0x10] sm:$0xff] }
  0x1c   :  { %v170_v30 = vadd.f32 %v149_v27, %v148_v26  ;;  %243 = vmatpush.bf16.msra.mxu0 %v234_v33  ;;  %vm215_vm2 = vcmask 1042434   ;;  %vm217_vm3 = vcmask 1043459   ;;  %vm219_vm4 = vcmask 1044484   ;;  %368 = vmatpush.bf16.msra.mxu2 %v513_v20  ;;  %v509_v24 = vld [vmem:[#allocation8 + $0x18] sm:$0xff]  ;;  %v507_v32 = vld [vmem:[#allocation8 + $0x8] sm:$0xff]  ;;  %v506_v33 = vld [vmem:[#allocation8] sm:$0xff] }
  0x1d   :  { %v173_v31 = vadd.f32 %v151_v29, %v150_v28  ;;  %vm221_vm5 = vcmask 1045509   ;;  %vm223_vm6 = vcmask 1046534   ;;  %vm225_vm7 = vcmask 1047559   ;;  %v524_v26 = vld [vmem:[%s767_s2] ss:$0 sm:$0xff] }
  0x1e   :  { %vm228_vm8 = vcmask 64512   ;;  %v525_v34 = vld [vmem:[%s769_s4] ss:$0 sm:$0xff]  ;;  %s416_s4 = sshll.u32 %s773_s8, 4  ;;  %s405_s8 = sshll.u32 %s772_s7, 4  ;;  %s417_s4 = int_to_ptr.hbm [resolvable:$true] %s416_s4  ;;  %s406_s8 = int_to_ptr.hbm [resolvable:$true] %s405_s8 }
  0x1f   :  { %303 = vmatpush.bf16.msra.mxu1 %v504_v35  ;;  %v526_v40 = vld [vmem:[%s771_s6] ss:$0 sm:$0xff]  ;;  %s692_s6 = smov [#allocation10]  }
  0x20   :  { %s403_s12 = sshll.u32 %s692_s6, 4  ;;  %s404_s12 = int_to_ptr.vmem [resolvable:$true] %s403_s12 }
  0x22   :  { %156 = vadd.xlane.f32.xlu0 %v155_v21  ;;  %162 = vadd.xlane.f32.xlu1 %v161_v22  ;;  %v512_v21 = vld [vmem:[#allocation8 + $0x30] sm:$0xff]  ;;  %v511_v22 = vld [vmem:[#allocation8 + $0x28] sm:$0xff] }
  0x23   :  { %168 = vadd.xlane.f32.xlu2 %v167_v23  ;;  %304 = vmatpush.bf16.msra.mxu1 %v503_v39  ;;  %v510_v23 = vld [vmem:[#allocation8 + $0x20] sm:$0xff] }
  0x24   :  { %369 = vmatpush.bf16.msra.mxu2 %v512_v21 }
  0x27   :  { %305 = vmatpush.bf16.msra.mxu1 %v502_v42 }
  0x28   :  { %370 = vmatpush.bf16.msra.mxu2 %v511_v22 }
  0x2a   :  { %171 = vadd.xlane.f32.xlu0 %v170_v30  ;;  %174 = vadd.xlane.f32.xlu1 %v173_v31 }
  0x2b   :  { %306 = vmatpush.bf16.msra.mxu1 %v501_v52 }
  0x2c   :  { %371 = vmatpush.bf16.msra.mxu2 %v510_v23 }
  0x2f   :  { %307 = vmatpush.bf16.msra.mxu1 %v500_v61 }
  0x30   :  { %372 = vmatpush.bf16.msra.mxu2 %v509_v24 }
  0x33   :  { %308 = vmatpush.bf16.msra.mxu1 %v499_v18 }
  0x34   :  { %373 = vmatpush.bf16.msra.mxu2 %v508_v25 }
  0x37   :  { %309 = vmatpush.bf16.msra.mxu1 %v498_v19 }
  0x38   :  { %374 = vmatpush.bf16.msra.mxu2 %v507_v32 }
  0x3c   :  { %375 = vmatpush.bf16.msra.mxu2 %v506_v33 }
  0x8d   :  { %v154_v36 = vpop.xlane.xlu0 %153  ;;  %v160_v37 = vpop.xlane.xlu1 %159 }
  0x8e   :  { %v166_v38 = vpop.xlane.xlu2 %165  ;;  %v176_v41 = vpack.c.bf16 %v154_v36, %v154_v36  ;;  %v178_v43 = vpack.c.bf16 %v160_v37, %v160_v37 }
  0x8f   :  { %v180_v48 = vpack.c.bf16 %v166_v38, %v166_v38 }
  0x90   :  { %v195_v47 = vunpack.c.l.b16 %v176_v41  ;;  %v197_v53 = vunpack.c.l.b16 %v178_v43 }
  0x91   :  { %v199_v58 = vunpack.c.l.b16 %v180_v48 }
  0x92   :  { %v205_v57 = vperm.slane %v195_v47, %v204_v44  ;;  %v207_v62 = vperm.slane %v197_v53, %v204_v44 }
  0x93   :  { %v209_v4 = vperm.slane %v199_v58, %v204_v44 }
  0x95   :  { %v157_v45 = vpop.xlane.xlu0 %156  ;;  %v163_v46 = vpop.xlane.xlu1 %162 }
  0x96   :  { %v177_v49 = vpack.c.bf16 %v157_v45, %v157_v45  ;;  %v179_v50 = vpack.c.bf16 %v163_v46, %v163_v46  ;;  %v169_v51 = vpop.xlane.xlu2 %168 }
  0x97   :  { %v181_v54 = vpack.c.bf16 %v169_v51, %v169_v51 }
  0x98   :  { %v196_v55 = vunpack.c.l.b16 %v177_v49  ;;  %v198_v56 = vunpack.c.l.b16 %v179_v50 }
  0x99   :  { %v200_v63 = vunpack.c.l.b16 %v181_v54 }
  0x9a   :  { %v206_v59 = vperm.slane %v196_v55, %v204_v44  ;;  %v208_v60 = vperm.slane %v198_v56, %v204_v44 }
  0x9b   :  { %v210_v8 = vperm.slane %v200_v63, %v204_v44 }
  0x9c   :  { %v214_v0 = vsel %vm213_vm1, %v206_v59, %v205_v57 }
  0x9d   :  { %v216_v1 = vsel %vm215_vm2, %v207_v62, %v214_v0  ;;  %v172_v2 = vpop.xlane.xlu0 %171  ;;  %v175_v3 = vpop.xlane.xlu1 %174 }
  0x9e   :  { %v218_v5 = vsel %vm217_vm3, %v208_v60, %v216_v1  ;;  %v182_v6 = vpack.c.bf16 %v172_v2, %v172_v2  ;;  %v183_v7 = vpack.c.bf16 %v175_v3, %v175_v3 }
  0x9f   :  { %v220_v9 = vsel %vm219_vm4, %v209_v4, %v218_v5 }
  0xa0   :  { %v201_v10 = vunpack.c.l.b16 %v182_v6  ;;  %v202_v11 = vunpack.c.l.b16 %v183_v7  ;;  %v222_v14 = vsel %vm221_vm5, %v210_v8, %v220_v9 }
  0xa2   :  { %v211_v12 = vperm.slane %v201_v10, %v204_v44  ;;  %v212_v13 = vperm.slane %v202_v11, %v204_v44 }
  0xa4   :  { %v224_v15 = vsel %vm223_vm6, %v211_v12, %v222_v14 }
  0xa5   :  { %v226_v16 = vsel %vm225_vm7, %v212_v13, %v224_v15 }
  0xa6   :  { %v227_v17 = vpack.c.b16 %v226_v16, %v226_v16 }
  0xa8   :  { %433 = vmatmul.msk.bf16.vlgmr.msra.gmra.mxu0 %vm228_vm8, %v227_v17 }
 0x125   :  { %v245_v27 = vpop.f32.mrf.mxu0 }
 0x126   :  { %v246_v28 = vadd.f32 %v524_v26, %v245_v27 }
 0x128   :  { %v249_v29 = vmax.f32 %v246_v28, 0.0 }
 0x12a   :  { %397 = vst [vmem:[#allocation11] sm:$0xff] %v249_v29  ;;  %v250_v30 = vpack.c.bf16 %v249_v29, %v249_v29 }
 0x12b   :  { %419 = dma.vmem_to_hbm [thread:$0]  %s415_s9, 128, %s417_s4, [#allocation12]  }
 0x12c   :  { %310 = vmatmul.bf16.vlgmr.msra.gmra.mxu1 %v250_v30 }
 0x12d   :  { %v247_v31 = vpop.f32.mrf.mxu0 }
 0x1a9   :  { %v311_v35 = vpop.f32.mrf.mxu1 }
 0x1aa   :  { %v312_v36 = vadd.f32 %v525_v34, %v311_v35 }
 0x1ac   :  { %v315_v37 = vmax.f32 %v312_v36, 0.0 }
 0x1ae   :  { %v316_v38 = vpack.c.bf16 %v315_v37, %v315_v37 }
 0x1b0   :  { %376 = vmatmul.bf16.vlgmr.msra.gmra.mxu2 %v316_v38 }
 0x1b1   :  { %v313_v39 = vpop.f32.mrf.mxu1 }
 0x233   :  { %v377_v41 = vpop.f32.mrf.mxu2 }
 0x234   :  { %v378_v42 = vadd.f32 %v526_v40, %v377_v41 }
 0x236   :  { %v381_v43 = vmul.f32 %v378_v42, %v378_v42 }
 0x238   :  { %382 = vadd.xlane.f32.xlu2 %v381_v43 }
 0x23b   :  { %v379_v44 = vpop.f32.mrf.mxu2 }
 0x2ab   :  { %v383_v45 = vpop.xlane.xlu2 %382 }
 0x2ac   :  { %v384_v46 = vmax.f32 %v383_v45, 1e-24 }
 0x2ae   :  { %527 = vrsqrt.f32 %v384_v46  ;;  %vm391_vm10 = vweird.f32 %v384_v46 }
 0x2b4   :  { %v528_v47 = vpop.eup %527 }
 0x2b5   :  { %v386_v48 = vmul.f32 %v528_v47, %v384_v46  ;;  %vm392_vm9 = vweird.f32 %v528_v47 }
 0x2b6   :  { %vm393_vm11 = vmor %vm391_vm10, %vm392_vm9 }
 0x2b7   :  { %v387_v49 = vmul.f32 %v528_v47, %v386_v48 }
 0x2b9   :  { %v388_v50 = vmul.f32 0.5, %v387_v49 }
 0x2bb   :  { %v389_v51 = vsub.f32 1.5, %v388_v50 }
 0x2bd   :  { %v390_v52 = vmul.f32 %v528_v47, %v389_v51 }
 0x2bf   :  { %v394_v53 = vsel %vm393_vm11, %v528_v47, %v390_v52 }
 0x2c0   :  { %v395_v54 = vmul.f32 %v394_v53, %v378_v42 }
 0x2c2   :  { %396 = vst [vmem:[#allocation10] sm:$0xff] %v395_v54 }
 0x2c3   :  { %408 = dma.vmem_to_hbm [thread:$0]  %s404_s12, 128, %s406_s8, [#allocation4]  }
 0x2c4   :  { %679 = dma.done.wait [#allocation4], 128  }
 0x2c5   :  { %680 = vsyncadd [#allocation4], 4294967168 }
 0x2c6   :  { %681 = dma.done.wait [#allocation12], 128  }
 0x2c7   :  { %682 = vsyncadd [#allocation12], 4294967168 }
 0x2c8   :  { %428 = vsyncpa [#allocation3], 1 }
 0x2c9   :  { %429 = vsyncpa [#allocation6], 1 }
 0x2ca   :  { %430 = vsyncpa [#allocation9], 1 }
 0x2cb   :  { %431 = vsyncpa [#allocation4], 1 }
 0x2cc   :  { %432 = vsyncpa [#allocation12], 1 }

</bundles_post_ra>
